<compile_context>
chip_gen: v6e
topology: v6e:2x2x1
jax: 0.10.0
libtpu: 0.0.40
codegen_flags: <defaults>
</compile_context>

<pallas_src>
import jax
import jax.numpy as jnp
from jax.experimental import pallas as pl
from jax.experimental.pallas import tpu as pltpu


def _policy_mlp_kernel(x_ref, w1_ref, b1_ref, w2_ref, b2_ref, w3_ref, b3_ref,
                       o_ref):
    wdt = w1_ref.dtype  # bf16 weights (or f32 if caller keeps full precision)
    # Layer 1: Linear + ReLU   (bf16 x bf16 -> f32 accumulate on the MXU)
    h1 = jnp.dot(x_ref[...].astype(wdt), w1_ref[...],
                 preferred_element_type=jnp.float32)
    h1 = jnp.maximum(h1 + b1_ref[...], 0.0)
    # Layer 2: Linear + ReLU
    h2 = jnp.dot(h1.astype(wdt), w2_ref[...],
                 preferred_element_type=jnp.float32)
    h2 = jnp.maximum(h2 + b2_ref[...], 0.0)
    # Layer 3: Linear (logits, no activation); store in o_ref.dtype (bf16 by
    # default) — the accumulate above stays f32.
    logits = jnp.dot(h2.astype(wdt), w3_ref[...],
                     preferred_element_type=jnp.float32)
    o_ref[...] = (logits + b3_ref[...]).astype(o_ref.dtype)


def _round_up(n, m):
    return ((n + m - 1) // m) * m


def _pick_block_b(B, *, cap=2048, min_tile=512, cores=2):
    """Batch tile choice.

    Small batches (<= 2*min_tile) run as one tile (block == full dim is always
    legal). Larger batches are split into at least 2*cores tiles so that (a)
    v7x's two TensorCores both get >= 2 grid steps of the "parallel" axis and
    (b) input DMA / compute / ~MiB-scale output writeback overlap via Pallas
    pipelining, while tiles stay in [min_tile, cap] rows (multiple of 8) to
    amortize the ~0.35 us per-grid-step overhead and bound VMEM on v7x.
    """
    if B <= 2 * min_tile:
        return B
    n_tiles = max(2 * cores, pl.cdiv(B, cap))
    bb = pl.cdiv(B, n_tiles)
    bb = max(min_tile, _round_up(bb, 8))
    return min(bb, cap)


def _vmem_limit_bytes(block_b, latent_dim, hidden, vocab, out_bytes, w_bytes):
    """Scoped-VMEM budget from lane-padded tile sizes (v5e default is 16 MiB)."""
    lat_p = _round_up(latent_dim, 128)   # x tile is lane-padded 32 -> 128
    hid_p = _round_up(hidden, 128)
    voc_p = _round_up(vocab, 128)
    x_buf = block_b * lat_p * 4                      # f32 input tile
    out_buf = block_b * voc_p * out_bytes            # logits tile
    acts = 2 * block_b * hid_p * 4                   # f32 h1/h2 temporaries
    weights = (lat_p * hid_p + hid_p * hid_p + hid_p * voc_p) * w_bytes \
        + (2 * hid_p + voc_p) * 4                    # resident weights + biases
    need = 2 * (x_buf + out_buf + weights) + acts    # double-buffered streams
    limit = int(need * 1.5)                          # compiler-temp headroom
    return max(16 << 20, min(limit, 48 << 20))       # <= v7x 64 MiB physical


def world_model_controller_forward(latent_state, params, *, block_b=None,
                                   out_dtype=jnp.bfloat16, out_buffers=2):
    """Runs the fused 3-layer MLP policy head in a single Pallas kernel.

    latent_state: (B, latent_dim) float32 (bf16 latents also accepted)
    params: dict with w1 (latent_dim, H), b1 (1, H), w2 (H, H), b2 (1, H),
            w3 (H, V), b3 (1, V). Weights may be bf16 (recommended); biases f32.
    out_dtype: logits dtype; bf16 halves the dominant HBM writeback stream.
    out_buffers: >2 enables deeper output pipelining (sweep if writeback is
                 exposed in a profile).
    """
    B, latent_dim = latent_state.shape
    H = params["w1"].shape[1]
    V = params["w3"].shape[1]

    if block_b is None:
        block_b = _pick_block_b(B)
    block_b = min(block_b, B)
    if block_b != B and block_b % 8 != 0:
        raise ValueError(
            f"block_b={block_b} must be a multiple of 8 or equal to B={B} "
            "(TPU sublane constraint).")

    grid = (pl.cdiv(B, block_b),)

    out_spec_kwargs = {}
    if out_buffers > 2 and grid[0] > 1:
        out_spec_kwargs["pipeline_mode"] = pl.Buffered(out_buffers)
    out_spec = pl.BlockSpec((block_b, V), lambda i: (i, 0), **out_spec_kwargs)

    vmem_limit = _vmem_limit_bytes(
        block_b, latent_dim, H, V,
        out_bytes=jnp.dtype(out_dtype).itemsize,
        w_bytes=jnp.dtype(params["w1"].dtype).itemsize)

    out = pl.pallas_call(
        _policy_mlp_kernel,
        out_shape=jax.ShapeDtypeStruct((B, V), out_dtype),
        grid_spec=pltpu.PrefetchScalarGridSpec(
            num_scalar_prefetch=0,
            grid=grid,
            in_specs=[
                # x: tiled over batch (pipelined HBM<->VMEM per grid step)
                pl.BlockSpec((block_b, latent_dim), lambda i: (i, 0)),
                # weights / biases: resident, same block every grid step
                pl.BlockSpec((latent_dim, H), lambda i: (0, 0)),
                pl.BlockSpec((1, H), lambda i: (0, 0)),
                pl.BlockSpec((H, H), lambda i: (0, 0)),
                pl.BlockSpec((1, H), lambda i: (0, 0)),
                pl.BlockSpec((H, V), lambda i: (0, 0)),
                pl.BlockSpec((1, V), lambda i: (0, 0)),
            ],
            out_specs=out_spec,
        ),
        compiler_params=pltpu.CompilerParams(
            # batch axis is independent -> megacore-shardable on v7x
            dimension_semantics=("parallel",),
            vmem_limit_bytes=vmem_limit),
    )(latent_state, params["w1"], params["b1"], params["w2"], params["b2"],
      params["w3"], params["b3"])
    return out


def init_params(key, latent_dim, vocab_size, hidden_dim=128,
                weight_dtype=jnp.bfloat16):
    """Deterministic synthetic init (PyTorch-Linear-like uniform fan-in).

    Weights are stored (in, out) (= transpose of torch's (out, in)) and cast
    to `weight_dtype` (bf16 by default) to halve HBM weight traffic; biases
    stay float32.
    """
    ks = jax.random.split(key, 6)

    def lin(kw, kb, fan_in, fan_out):
        bound = 1.0 / jnp.sqrt(fan_in)
        w = jax.random.uniform(kw, (fan_in, fan_out), jnp.float32, -bound, bound)
        b = jax.random.uniform(kb, (1, fan_out), jnp.float32, -bound, bound)
        return w.astype(weight_dtype), b

    w1, b1 = lin(ks[0], ks[1], latent_dim, hidden_dim)
    w2, b2 = lin(ks[2], ks[3], hidden_dim, hidden_dim)
    w3, b3 = lin(ks[4], ks[5], hidden_dim, vocab_size)
    return {"w1": w1, "b1": b1, "w2": w2, "b2": b2, "w3": w3, "b3": b3}


def reference_forward(latent_state, p):
    """Plain-JAX f32 reference mirroring the PyTorch nn.Sequential
    (weights upcast from their stored dtype)."""
    w1 = p["w1"].astype(jnp.float32)
    w2 = p["w2"].astype(jnp.float32)
    w3 = p["w3"].astype(jnp.float32)
    h = jnp.maximum(latent_state @ w1 + p["b1"], 0.0)
    h = jnp.maximum(h @ w2 + p["b2"], 0.0)
    return h @ w3 + p["b3"]


if __name__ == "__main__":
    latent_dim = 32
    vocab_size = 256
    hidden_dim = 128
    batch = 8

    key = jax.random.PRNGKey(0)
    k_params, k_x, k_x2, k_x3 = jax.random.split(key, 4)
    params = init_params(k_params, latent_dim, vocab_size, hidden_dim)

    # --- small-batch case: single grid step, default bf16 logits ---
    latent_state = jax.random.normal(k_x, (batch, latent_dim), jnp.float32)
    logits = world_model_controller_forward(latent_state, params)
    logits = jax.block_until_ready(logits)
    ref = reference_forward(latent_state, params)
    assert logits.shape == (batch, vocab_size)
    assert logits.dtype == jnp.bfloat16
    # bf16 MXU inputs + bf16 output with f32 accumulation -> loose tolerance
    assert jnp.allclose(logits.astype(jnp.float32), ref, atol=5e-2, rtol=5e-2)

    # --- same inputs with f32 logits (out_dtype knob) ---
    logits_f32 = world_model_controller_forward(latent_state, params,
                                                out_dtype=jnp.float32)
    logits_f32 = jax.block_until_ready(logits_f32)
    assert logits_f32.dtype == jnp.float32
    assert jnp.allclose(logits_f32, ref, atol=5e-2, rtol=5e-2)

    # --- tiled case: grid > 1 exercises the pipelined / parallel path ---
    batch2, block_b2 = 48, 16
    latent_state2 = jax.random.normal(k_x2, (batch2, latent_dim), jnp.float32)
    logits2 = world_model_controller_forward(latent_state2, params,
                                             block_b=block_b2)
    logits2 = jax.block_until_ready(logits2)
    ref2 = reference_forward(latent_state2, params)
    assert logits2.shape == (batch2, vocab_size)
    assert jnp.allclose(logits2.astype(jnp.float32), ref2,
                        atol=5e-2, rtol=5e-2)

    # --- ragged case: B % block_b != 0 (last tile padded, padding discarded) ---
    batch3, block_b3 = 40, 16
    latent_state3 = jax.random.normal(k_x3, (batch3, latent_dim), jnp.float32)
    logits3 = world_model_controller_forward(latent_state3, params,
                                             block_b=block_b3)
    logits3 = jax.block_until_ready(logits3)
    ref3 = reference_forward(latent_state3, params)
    assert logits3.shape == (batch3, vocab_size)
    assert jnp.allclose(logits3.astype(jnp.float32), ref3,
                        atol=5e-2, rtol=5e-2)

    print("KERNEL_OK")
</pallas_src>

<mosaic_0001>
module attributes {stable_mosaic.version = 11 : i64} {
  func.func @_policy_mlp_kernel(%arg0: i32, %arg1: memref<8x32xf32, #tpu.memory_space<vmem>>, %arg2: memref<32x128xbf16, #tpu.memory_space<vmem>>, %arg3: memref<1x128xf32, #tpu.memory_space<vmem>>, %arg4: memref<128x128xbf16, #tpu.memory_space<vmem>>, %arg5: memref<1x128xf32, #tpu.memory_space<vmem>>, %arg6: memref<128x256xbf16, #tpu.memory_space<vmem>>, %arg7: memref<1x256xf32, #tpu.memory_space<vmem>>, %arg8: memref<8x256xbf16, #tpu.memory_space<vmem>>) attributes {dimension_semantics = [#tpu.dimension_semantics<parallel>], iteration_bounds = array<i64: 1>, scalar_prefetch = 0 : i64, scratch_operands = 0 : i64, tpu.core_type = #tpu.core_type<tc>, window_params = [{transform_indices = @transform_0, window_bounds = array<i64: 8, 32>}, {pipeline_mode = #tpu.pipeline_mode<synchronous>, transform_indices = @transform_1, window_bounds = array<i64: 32, 128>}, {pipeline_mode = #tpu.pipeline_mode<synchronous>, transform_indices = @transform_2, window_bounds = array<i64: 1, 128>}, {pipeline_mode = #tpu.pipeline_mode<synchronous>, transform_indices = @transform_3, window_bounds = array<i64: 128, 128>}, {pipeline_mode = #tpu.pipeline_mode<synchronous>, transform_indices = @transform_4, window_bounds = array<i64: 1, 128>}, {pipeline_mode = #tpu.pipeline_mode<synchronous>, transform_indices = @transform_5, window_bounds = array<i64: 128, 256>}, {pipeline_mode = #tpu.pipeline_mode<synchronous>, transform_indices = @transform_6, window_bounds = array<i64: 1, 256>}, {transform_indices = @transform_7, window_bounds = array<i64: 8, 256>}]} {
    %c0 = arith.constant 0 : index
    %c0_0 = arith.constant 0 : index
    %0 = vector.load %arg1[%c0, %c0_0] : memref<8x32xf32, #tpu.memory_space<vmem>>, vector<8x32xf32>
    %1 = arith.truncf %0 : vector<8x32xf32> to vector<8x32xbf16>
    %c0_1 = arith.constant 0 : index
    %c0_2 = arith.constant 0 : index
    %2 = vector.load %arg2[%c0_1, %c0_2] : memref<32x128xbf16, #tpu.memory_space<vmem>>, vector<32x128xbf16>
    %cst = arith.constant dense<0.000000e+00> : vector<8x128xf32>
    %3 = tpu.matmul %1, %2, %cst {dimension_numbers = #tpu.dot_dimension_numbers<[1], [0], [0], [1], [0, 0, 1, 1], [], []>} : vector<8x32xbf16>, vector<32x128xbf16>, vector<8x128xf32> -> vector<8x128xf32>
    %c0_3 = arith.constant 0 : index
    %c0_4 = arith.constant 0 : index
    %4 = vector.load %arg3[%c0_3, %c0_4] : memref<1x128xf32, #tpu.memory_space<vmem>>, vector<1x128xf32>
    %5 = vector.broadcast %4 : vector<1x128xf32> to vector<8x128xf32>
    %6 = arith.addf %3, %5 : vector<8x128xf32>
    %cst_5 = arith.constant 0.000000e+00 : f32
    %7 = vector.broadcast %cst_5 : f32 to vector<8x128xf32>
    %8 = arith.maximumf %6, %7 : vector<8x128xf32>
    %9 = arith.truncf %8 : vector<8x128xf32> to vector<8x128xbf16>
    %c0_6 = arith.constant 0 : index
    %c0_7 = arith.constant 0 : index
    %10 = vector.load %arg4[%c0_6, %c0_7] : memref<128x128xbf16, #tpu.memory_space<vmem>>, vector<128x128xbf16>
    %cst_8 = arith.constant dense<0.000000e+00> : vector<8x128xf32>
    %11 = tpu.matmul %9, %10, %cst_8 {dimension_numbers = #tpu.dot_dimension_numbers<[1], [0], [0], [1], [0, 0, 1, 1], [], []>} : vector<8x128xbf16>, vector<128x128xbf16>, vector<8x128xf32> -> vector<8x128xf32>
    %c0_9 = arith.constant 0 : index
    %c0_10 = arith.constant 0 : index
    %12 = vector.load %arg5[%c0_9, %c0_10] : memref<1x128xf32, #tpu.memory_space<vmem>>, vector<1x128xf32>
    %13 = vector.broadcast %12 : vector<1x128xf32> to vector<8x128xf32>
    %14 = arith.addf %11, %13 : vector<8x128xf32>
    %cst_11 = arith.constant 0.000000e+00 : f32
    %15 = vector.broadcast %cst_11 : f32 to vector<8x128xf32>
    %16 = arith.maximumf %14, %15 : vector<8x128xf32>
    %17 = arith.truncf %16 : vector<8x128xf32> to vector<8x128xbf16>
    %c0_12 = arith.constant 0 : index
    %c0_13 = arith.constant 0 : index
    %18 = vector.load %arg6[%c0_12, %c0_13] : memref<128x256xbf16, #tpu.memory_space<vmem>>, vector<128x256xbf16>
    %cst_14 = arith.constant dense<0.000000e+00> : vector<8x256xf32>
    %19 = tpu.matmul %17, %18, %cst_14 {dimension_numbers = #tpu.dot_dimension_numbers<[1], [0], [0], [1], [0, 0, 1, 1], [], []>} : vector<8x128xbf16>, vector<128x256xbf16>, vector<8x256xf32> -> vector<8x256xf32>
    %c0_15 = arith.constant 0 : index
    %c0_16 = arith.constant 0 : index
    %20 = vector.load %arg7[%c0_15, %c0_16] : memref<1x256xf32, #tpu.memory_space<vmem>>, vector<1x256xf32>
    %21 = vector.broadcast %20 : vector<1x256xf32> to vector<8x256xf32>
    %22 = arith.addf %19, %21 : vector<8x256xf32>
    %23 = arith.truncf %22 : vector<8x256xf32> to vector<8x256xbf16>
    %c0_17 = arith.constant 0 : index
    %c0_18 = arith.constant 0 : index
    %24 = vector.load %arg8[%c0_17, %c0_18] : memref<8x256xbf16, #tpu.memory_space<vmem>>, vector<8x256xbf16>
    tpu.vector_store %arg8[%c0_17, %c0_18], %23 {strides = array<i32>} : memref<8x256xbf16, #tpu.memory_space<vmem>>, vector<8x256xbf16>,
    return
  }
  func.func @transform_0(%arg0: i32) -> (i32, i32) {
    %c0_i32 = arith.constant 0 : i32
    %c0_i32_0 = arith.constant 0 : i32
    return %arg0, %c0_i32 : i32, i32
  }
  func.func @transform_1(%arg0: i32) -> (i32, i32) {
    %c0_i32 = arith.constant 0 : i32
    %c0_i32_0 = arith.constant 0 : i32
    %c0_i32_1 = arith.constant 0 : i32
    return %c0_i32, %c0_i32_0 : i32, i32
  }
  func.func @transform_2(%arg0: i32) -> (i32, i32) {
    %c0_i32 = arith.constant 0 : i32
    %c0_i32_0 = arith.constant 0 : i32
    %c0_i32_1 = arith.constant 0 : i32
    return %c0_i32, %c0_i32_0 : i32, i32
  }
  func.func @transform_3(%arg0: i32) -> (i32, i32) {
    %c0_i32 = arith.constant 0 : i32
    %c0_i32_0 = arith.constant 0 : i32
    %c0_i32_1 = arith.constant 0 : i32
    return %c0_i32, %c0_i32_0 : i32, i32
  }
  func.func @transform_4(%arg0: i32) -> (i32, i32) {
    %c0_i32 = arith.constant 0 : i32
    %c0_i32_0 = arith.constant 0 : i32
    %c0_i32_1 = arith.constant 0 : i32
    return %c0_i32, %c0_i32_0 : i32, i32
  }
  func.func @transform_5(%arg0: i32) -> (i32, i32) {
    %c0_i32 = arith.constant 0 : i32
    %c0_i32_0 = arith.constant 0 : i32
    %c0_i32_1 = arith.constant 0 : i32
    return %c0_i32, %c0_i32_0 : i32, i32
  }
  func.func @transform_6(%arg0: i32) -> (i32, i32) {
    %c0_i32 = arith.constant 0 : i32
    %c0_i32_0 = arith.constant 0 : i32
    %c0_i32_1 = arith.constant 0 : i32
    return %c0_i32, %c0_i32_0 : i32, i32
  }
  func.func @transform_7(%arg0: i32) -> (i32, i32) {
    %c0_i32 = arith.constant 0 : i32
    %c0_i32_0 = arith.constant 0 : i32
    return %arg0, %c0_i32 : i32, i32
  }
}

</mosaic_0001>

<bundles_post_ra>
// kernel: tpu_custom_call.1
= control target key start
LH: loop header
LB: loop body
LE: loop exit
PB: predicated region body
PF: predicated region fallthrough
CT: control target
= control target key end

     0   :  { %12 = vsyncpa [#allocation3], 0  ;;  %s741_s0 = inlined_call_operand.hbm [shape: f32[8,32], index: 0, kind: input, shape index: {}]   ;;  %s742_s1 = inlined_call_operand.hbm [shape: bf16[32,128], index: 1, kind: input, shape index: {}]   ;;  %s743_s2 = inlined_call_operand.vmem [shape: f32[1,128], index: 2, kind: input, shape index: {}]   ;;  %s744_s3 = inlined_call_operand.hbm [shape: bf16[128,128], index: 3, kind: input, shape index: {}]   ;;  %s745_s4 = inlined_call_operand.vmem [shape: f32[1,128], index: 4, kind: input, shape index: {}]   ;;  %s746_s5 = inlined_call_operand.hbm [shape: bf16[128,256], index: 5, kind: input, shape index: {}]   ;;  %s747_s6 = inlined_call_operand.vmem [shape: f32[1,256], index: 6, kind: input, shape index: {}]   ;;  %s748_s7 = inlined_call_operand.hbm [shape: bf16[8,256], index: 7, kind: output, shape index: {}]  }
   0x1   :  { %13 = vsyncpa [#allocation6], 0 }
   0x2   :  { %14 = vsyncpa [#allocation9], 0 }
   0x3   :  { %15 = vsyncpa [#allocation4], 0  ;;  %s665_s24 = smov [#allocation5]  }
   0x4   :  { %s31_s25 = sshll.u32 %s665_s24, 4  ;;  %s32_s25 = int_to_ptr.vmem [resolvable:$true] %s31_s25 }
   0x5   :  { %s565_s26 = scalar_lea.vmem %s32_s25, 256  ;;  %p570_p1 = scmp.lt.s32.totalorder %s32_s25, %s32_s25 }
   0x6   :  { %p566_p0 = scmp.ne.s32.totalorder %s32_s25, %s565_s26  ;;  %p571_p2 = scmp.lt.s32.totalorder %s565_s26, %s565_s26 }
   0x8   :  { %p572_p3 = por %p571_p2, %p570_p1 }
   0xa   :  { %p573_p4 = pnand %p572_p3, %p566_p0 }
   0xc   :  { %576 = shalt.err (!%p573_p4)
}
   0xd   :  { %s666_s27 = smov 64   ;;  %s667_s28 = smov 4  }
   0xe   :  { %37 = dma.hbm_to_vmem [thread:$0]  %s742_s1, 256, %s32_s25, [#allocation6], %s666_s27, %s666_s27, %s667_s28  }
   0xf   :  { %s668_s8 = smov [#allocation2]   ;;  %s669_s10 = smov [#allocation7]  }
  0x10   :  { %s22_s9 = sshll.u32 %s668_s8, 4  ;;  %s45_s11 = sshll.u32 %s669_s10, 4  ;;  %s23_s9 = int_to_ptr.vmem [resolvable:$true] %s22_s9  ;;  %s46_s11 = int_to_ptr.vmem [resolvable:$true] %s45_s11 }
  0x11   :  { %s585_s12 = scalar_lea.vmem %s23_s9, 128  ;;  %p590_p6 = scmp.lt.s32.totalorder %s23_s9, %s23_s9 }
  0x12   :  { %p586_p5 = scmp.ne.s32.totalorder %s23_s9, %s585_s12  ;;  %p591_p7 = scmp.lt.s32.totalorder %s585_s12, %s585_s12 }
  0x14   :  { %p592_p8 = por %p591_p7, %p590_p6 }
  0x16   :  { %p593_p9 = pnand %p592_p8, %p586_p5 }
  0x18   :  { %596 = shalt.err (!%p593_p9)
}
  0x19   :  { %25 = dma.hbm_to_vmem [thread:$0]  %s741_s0, 128, %s23_s9, [#allocation3]  }
  0x1a   :  { %s605_s15 = scalar_lea.vmem %s46_s11, 1024  ;;  %p610_p11 = scmp.lt.s32.totalorder %s46_s11, %s46_s11 }
  0x1b   :  { %p606_p10 = scmp.ne.s32.totalorder %s46_s11, %s605_s15  ;;  %p611_p12 = scmp.lt.s32.totalorder %s605_s15, %s605_s15 }
  0x1d   :  { %p612_p13 = por %p611_p12, %p610_p11 }
  0x1f   :  { %p613_p0 = pnand %p612_p13, %p606_p10 }
  0x21   :  { %616 = shalt.err (!%p613_p0)
}
  0x22   :  { %51 = dma.hbm_to_vmem [thread:$0]  %s744_s3, 1024, %s46_s11, [#allocation6], %s666_s27, %s666_s27, %s667_s28  }
  0x23   :  { %s670_s17 = smov [#allocation8]  }
  0x24   :  { %s59_s18 = sshll.u32 %s670_s17, 4  ;;  %s60_s18 = int_to_ptr.vmem [resolvable:$true] %s59_s18 }
  0x25   :  { %s625_s19 = scalar_lea.vmem %s60_s18, 2048  ;;  %p630_p2 = scmp.lt.s32.totalorder %s60_s18, %s60_s18 }
  0x26   :  { %p626_p1 = scmp.ne.s32.totalorder %s60_s18, %s625_s19  ;;  %p631_p3 = scmp.lt.s32.totalorder %s625_s19, %s625_s19 }
  0x28   :  { %p632_p4 = por %p631_p3, %p630_p2 }
  0x2a   :  { %p633_p5 = pnand %p632_p4, %p626_p1 }
  0x2c   :  { %636 = shalt.err (!%p633_p5)
}
  0x2d   :  { %s671_s0 = smov 128   ;;  %s672_s20 = smov 8  }
  0x2e   :  { %65 = dma.hbm_to_vmem [thread:$0]  %s746_s5, 2048, %s60_s18, [#allocation9], %s671_s0, %s671_s0, %s672_s20  }
  0x2f   :  { %657 = dma.done.wait [#allocation3], 128  }
  0x30   :  { %658 = vsyncadd [#allocation3], 4294967168 }
  0x31   :  { %659 = dma.done.wait [#allocation6], 1280  }
  0x32   :  { %660 = vsyncadd [#allocation6], 4294966016 }
  0x33   :  { %661 = dma.done.wait [#allocation9], 2048  }
  0x34   :  { %662 = vsyncadd [#allocation9], 4294965248  ;;  %v673_v0 = vmov 0.0   ;;  %vm674_vm0 = vmmov 0   ;;  %v523_v1 = vld [vmem:[#allocation5 + $0x8] sm:$0xff]   ;;  %v524_v2 = vld [vmem:[#allocation5] sm:$0xff]   ;;  %v283_v46 = vlaneseq }
  0x35   :  { %483 = vmatprep.subr.bf16.mxu0 %v673_v0  ;;  %487 = vmatprep.mubr.msk.bf16.mxu0 %vm674_vm0, %v673_v0  ;;  %v81_v3 = vld [vmem:[#allocation2] sm:$0xff]  ;;  %v525_v4 = vld [vmem:[#allocation7 + $0x38] sm:$0xff]   ;;  %v526_v6 = vld [vmem:[#allocation7 + $0x30] sm:$0xff]   ;;  %vm106_vm1 = vcmask 261120   ;;  %v675_v37 = vmov 0  }
  0x36   :  { %491 = vmatprep.subr.bf16.mxu1 %v673_v0  ;;  %507 = vmatprep.mubr.msk.bf16.mxu1 %vm674_vm0, %v673_v0  ;;  %v82_v5 = vpack.c.bf16 %v81_v3, %v81_v3  ;;  %v527_v7 = vld [vmem:[#allocation7 + $0x28] sm:$0xff]   ;;  %v528_v8 = vld [vmem:[#allocation7 + $0x20] sm:$0xff]   ;;  %v529_v9 = vld [vmem:[#allocation7 + $0x18] sm:$0xff]   ;;  %v284_v47 = vshrl.u32 %v283_v46, 7 }
  0x37   :  { %484 = vmatpush3.bf16.msra.mxu0 %v523_v1  ;;  %492 = vmatpush3.bf16.msra.mxu1 %v525_v4  ;;  %v530_v10 = vld [vmem:[#allocation7 + $0x10] sm:$0xff]   ;;  %v531_v11 = vld [vmem:[#allocation7 + $0x8] sm:$0xff]   ;;  %v532_v12 = vld [vmem:[#allocation7] sm:$0xff]  }
  0x38   :  { %485 = vmatprep.subr.bf16.mxu0 %v673_v0  ;;  %493 = vmatprep.subr.bf16.mxu1 %v673_v0  ;;  %v533_v13 = vld [vmem:[#allocation8 + $0x70] ss:$8 sps:$4 sm:$0xff]   ;;  %v535_v14 = vld [vmem:[#allocation8 + $0x74] ss:$8 sps:$4 sm:$0xff]   ;;  %v538_v15 = vld [vmem:[#allocation8 + $0x64] ss:$8 sps:$4 sm:$0xff]  }
  0x39   :  { %v536_v16 = vld [vmem:[#allocation8 + $0x60] ss:$8 sps:$4 sm:$0xff]   ;;  %v541_v17 = vld [vmem:[#allocation8 + $0x54] ss:$8 sps:$4 sm:$0xff]   ;;  %v539_v18 = vld [vmem:[#allocation8 + $0x50] ss:$8 sps:$4 sm:$0xff]  }
  0x3a   :  { %v544_v19 = vld [vmem:[#allocation8 + $0x44] ss:$8 sps:$4 sm:$0xff]   ;;  %v542_v20 = vld [vmem:[#allocation8 + $0x40] ss:$8 sps:$4 sm:$0xff]   ;;  %v547_v21 = vld [vmem:[#allocation8 + $0x34] ss:$8 sps:$4 sm:$0xff]  }
  0x3b   :  { %486 = vmatpush3.bf16.msra.mxu0 %v524_v2  ;;  %494 = vmatpush3.bf16.msra.mxu1 %v526_v6  ;;  %v545_v22 = vld [vmem:[#allocation8 + $0x30] ss:$8 sps:$4 sm:$0xff]   ;;  %v550_v23 = vld [vmem:[#allocation8 + $0x24] ss:$8 sps:$4 sm:$0xff]   ;;  %v548_v24 = vld [vmem:[#allocation8 + $0x20] ss:$8 sps:$4 sm:$0xff]  }
  0x3c   :  { %495 = vmatprep.subr.bf16.mxu1 %v673_v0  ;;  %373 = vmatprep.subr.bf16.mxu0 %v535_v14  ;;  %v553_v25 = vld [vmem:[#allocation8 + $0x14] ss:$8 sps:$4 sm:$0xff]   ;;  %v551_v26 = vld [vmem:[#allocation8 + $0x10] ss:$8 sps:$4 sm:$0xff]   ;;  %v440_v27 = vld [vmem:[%s743_s2] ss:$0 sm:$0xff] }
  0x3d   :  { %v556_v35 = vld [vmem:[#allocation8 + $0x4] ss:$8 sps:$4 sm:$0xff]   ;;  %v554_v36 = vld [vmem:[#allocation8] ss:$8 sps:$4 sm:$0xff]   ;;  %v285_v48 = vsub.s32 0, %v284_v47  ;;  %v289_v49 = vsub.s32 1, %v284_v47 }
  0x3e   :  { %488 = vmatmul.mubr.msk.bf16.vlgmr.msra.gmra.mxu0 %vm106_vm1, %v82_v5  ;;  %v444_v38 = vld [vmem:[%s745_s4] ss:$0 sm:$0xff]  ;;  %s676_s4 = smov [#allocation10]  }
  0x3f   :  { %496 = vmatpush3.bf16.msra.mxu1 %v527_v7  ;;  %374 = vmatpush1.bf16.msra.mxu0 %v533_v13  ;;  %v281_v50 = vld [vmem:[%s747_s6] sm:$0x3]  ;;  %s429_s26 = sshll.u32 %s676_s4, 4  ;;  %s430_s26 = int_to_ptr.vmem [resolvable:$true] %s429_s26 }
  0x40   :  { %497 = vmatprep.subr.bf16.mxu1 %v673_v0  ;;  %375 = vmatprep.subr.bf16.mxu0 %v538_v15  ;;  %v286_v51 = vrot.slane %v281_v50, %v285_v48  ;;  %v290_v52 = vrot.slane %v281_v50, %v289_v49  ;;  %s637_s27 = scalar_lea.vmem %s430_s26, 128  ;;  %p642_p7 = scmp.lt.s32.totalorder %s430_s26, %s430_s26 }
  0x41   :  { %405 = vmatprep.mubr.bf16.mxu0 %v675_v37  ;;  %p638_p6 = scmp.ne.s32.totalorder %s430_s26, %s637_s27  ;;  %p643_p8 = scmp.lt.s32.totalorder %s637_s27, %s637_s27 }
  0x43   :  { %498 = vmatpush3.bf16.msra.mxu1 %v528_v8  ;;  %376 = vmatpush1.bf16.msra.mxu0 %v536_v16  ;;  %p644_p9 = por %p643_p8, %p642_p7 }
  0x44   :  { %499 = vmatprep.subr.bf16.mxu1 %v673_v0  ;;  %377 = vmatprep.subr.bf16.mxu0 %v541_v17 }
  0x45   :  { %p645_p10 = pnand %p644_p9, %p638_p6 }
  0x47   :  { %500 = vmatpush3.bf16.msra.mxu1 %v529_v9  ;;  %378 = vmatpush1.bf16.msra.mxu0 %v539_v18 }
  0x48   :  { %501 = vmatprep.subr.bf16.mxu1 %v673_v0  ;;  %379 = vmatprep.subr.bf16.mxu0 %v544_v19 }
  0x4b   :  { %502 = vmatpush3.bf16.msra.mxu1 %v530_v10  ;;  %380 = vmatpush1.bf16.msra.mxu0 %v542_v20 }
  0x4c   :  { %503 = vmatprep.subr.bf16.mxu1 %v673_v0  ;;  %381 = vmatprep.subr.bf16.mxu0 %v547_v21 }
  0x4f   :  { %504 = vmatpush3.bf16.msra.mxu1 %v531_v11  ;;  %382 = vmatpush1.bf16.msra.mxu0 %v545_v22 }
  0x50   :  { %505 = vmatprep.subr.bf16.mxu1 %v673_v0  ;;  %383 = vmatprep.subr.bf16.mxu0 %v550_v23 }
  0x53   :  { %506 = vmatpush3.bf16.msra.mxu1 %v532_v12  ;;  %384 = vmatpush1.bf16.msra.mxu0 %v548_v24 }
  0x54   :  { %385 = vmatprep.subr.bf16.mxu0 %v553_v25 }
  0x57   :  { %386 = vmatpush1.bf16.msra.mxu0 %v551_v26 }
  0x58   :  { %387 = vmatprep.subr.bf16.mxu0 %v556_v35 }
  0x5b   :  { %388 = vmatpush1.bf16.msra.mxu0 %v554_v36 }
  0xfe   :  { %v144_v28 = vpop.f32.mrf.mxu0 }
  0xff   :  { %v145_v29 = vadd.f32 %v440_v27, %v144_v28 }
 0x100   :  { %v489_v30 = vpop.f32.mrf.mxu0 }
 0x101   :  { %v150_v31 = vmax.f32 %v145_v29, 0.0 }
 0x102   :  { %v147_v32 = vpop.f32.mrf.mxu0 }
 0x103   :  { %v151_v33 = vpack.c.bf16 %v150_v31, %v150_v31 }
 0x104   :  { %v490_v34 = vpop.f32.mrf.mxu0 }
 0x105   :  { %508 = vmatmul.mubr.bf16.vlgmr.msra.gmra.mxu1 %v151_v33 }
 0x1c5   :  { %v257_v39 = vpop.f32.mrf.mxu1 }
 0x1c6   :  { %v258_v40 = vadd.f32 %v444_v38, %v257_v39 }
 0x1c7   :  { %v509_v41 = vpop.f32.mrf.mxu1 }
 0x1c8   :  { %v263_v42 = vmax.f32 %v258_v40, 0.0 }
 0x1c9   :  { %v260_v43 = vpop.f32.mrf.mxu1 }
 0x1ca   :  { %v264_v44 = vpack.c.bf16 %v263_v42, %v263_v42 }
 0x1cb   :  { %v510_v45 = vpop.f32.mrf.mxu1 }
 0x1cc   :  { %406 = vmatmul.mubr.bf16.vlgmr.msra.gmra.mxu0 %v264_v44 }
 0x28c   :  { %v407_v53 = vpop.f32.mrf.mxu0 }
 0x28d   :  { %v408_v55 = vadd.f32 %v407_v53, %v286_v51 }
 0x28e   :  { %v409_v54 = vpop.f32.mrf.mxu0 }
 0x28f   :  { %v410_v56 = vadd.f32 %v409_v54, %v290_v52 }
 0x290   :  { %v411_v57 = vpop.f32.mrf.mxu0 }
 0x291   :  { %v470_v58 = vpack.c.bf16 %v410_v56, %v408_v55 }
 0x292   :  { %v412_v59 = vpop.f32.mrf.mxu0 }
 0x293   :  { %422 = vst [vmem:[#allocation10] sm:$0xff] %v470_v58 }
 0x294   :  { %648 = shalt.err (!%p645_p10)
}
 0x295   :  { %432 = dma.vmem_to_hbm [thread:$0]  %s430_s26, 128, %s748_s7, [#allocation4]  }
 0x296   :  { %663 = dma.done.wait [#allocation4], 128  }
 0x297   :  { %664 = vsyncadd [#allocation4], 4294967168 }
 0x298   :  { %436 = vsyncpa [#allocation3], 1 }
 0x299   :  { %437 = vsyncpa [#allocation6], 1 }
 0x29a   :  { %438 = vsyncpa [#allocation9], 1 }
 0x29b   :  { %439 = vsyncpa [#allocation4], 1 }

</bundles_post_ra>
